<compile_context>
chip_gen: v6e
topology: v6e:2x2x1
jax: 0.10.0
libtpu: 0.0.40
codegen_flags: <defaults>
</compile_context>

<pallas_src>
import functools

import jax
import jax.numpy as jnp
from jax.experimental import pallas as pl
from jax.experimental.pallas import tpu as pltpu


def _round_up(x, m):
    return ((x + m - 1) // m) * m


# ----------------------- Kernel 1a: small MLP head (h2 + dynamic bias) -----------------------

def _mlp_head_kernel(ind_ref, w1_ref, b1_ref, w2_ref, b2_ref, wb_ref, bb_ref,
                     h2_ref, db_ref):
    ind = ind_ref[...]                                                       # (1, MI) f32
    h1 = jnp.maximum(
        jnp.dot(ind, w1_ref[...], preferred_element_type=jnp.float32) + b1_ref[...], 0.0)
    h2_ref[...] = jnp.maximum(
        jnp.dot(h1, w2_ref[...], preferred_element_type=jnp.float32) + b2_ref[...], 0.0)
    db_ref[...] = (
        jnp.dot(ind, wb_ref[...], preferred_element_type=jnp.float32) + bb_ref[...])


def run_mlp_head(ind, params):
    MI = ind.shape[1]
    H1 = params["w1"].shape[1]
    H2 = params["w2"].shape[1]
    OC = params["wb"].shape[1]
    return pl.pallas_call(
        _mlp_head_kernel,
        out_shape=(jax.ShapeDtypeStruct((1, H2), jnp.float32),
                   jax.ShapeDtypeStruct((1, OC), jnp.float32)),
        grid=(1,),
        in_specs=[
            pl.BlockSpec((1, MI), lambda i: (0, 0)),
            pl.BlockSpec((MI, H1), lambda i: (0, 0)),
            pl.BlockSpec((1, H1), lambda i: (0, 0)),
            pl.BlockSpec((H1, H2), lambda i: (0, 0)),
            pl.BlockSpec((1, H2), lambda i: (0, 0)),
            pl.BlockSpec((MI, OC), lambda i: (0, 0)),
            pl.BlockSpec((1, OC), lambda i: (0, 0)),
        ],
        out_specs=(pl.BlockSpec((1, H2), lambda i: (0, 0)),
                   pl.BlockSpec((1, OC), lambda i: (0, 0))),
        compiler_params=pltpu.CompilerParams(dimension_semantics=("arbitrary",)),
    )(ind, params["w1"], params["b1"], params["w2"], params["b2"],
      params["wb"], params["bb"])


# ----------------------- Kernel 1b: bf16 stream of the big third linear layer -----------------------
# No carried state across the grid -> axis is 'parallel' (v7x megacore friendly).

def _w3_stream_kernel(h2_ref, w3_ref, b3_ref, wflat_ref):
    wf = jnp.dot(h2_ref[...], w3_ref[...].astype(jnp.float32),
                 preferred_element_type=jnp.float32)
    wf = wf + b3_ref[...].astype(jnp.float32)
    wflat_ref[...] = wf.astype(wflat_ref.dtype)


def run_w3_stream(h2, w3_bf16, b3_bf16, *, tw=4096):
    H2, NWp = w3_bf16.shape                      # NWp is a multiple of 128 (padded at init)
    TW = NWp if NWp <= tw else tw
    grid = (pl.cdiv(NWp, TW),)
    return pl.pallas_call(
        _w3_stream_kernel,
        out_shape=jax.ShapeDtypeStruct((1, NWp), jnp.bfloat16),
        grid=grid,
        in_specs=[
            pl.BlockSpec((1, H2), lambda i: (0, 0)),
            pl.BlockSpec((H2, TW), lambda i: (0, i)),
            pl.BlockSpec((1, TW), lambda i: (0, i)),
        ],
        out_specs=pl.BlockSpec((1, TW), lambda i: (0, i)),
        compiler_params=pltpu.CompilerParams(dimension_semantics=("parallel",)),
    )(h2, w3_bf16, b3_bf16)


# ----------------------- Kernel 2: fused im2col + conv GEMM -----------------------
#   x_ref : (1, C, XWp)     bf16  -- one padded image, flattened spatial, zero-padded to XWp
#   w_ref : (K*K, OC_T, C)  bf16  -- generated weights, tap-major
#   b_ref : (OC_T, 1)       f32
#   o_ref : (1, OC_T, LO)   out_dtype -- column j corresponds to window corner (j//Wp, j%Wp)

def _dyn_conv_kernel(x_ref, w_ref, b_ref, o_ref, *, K, C, Wp, LO, OC_T):
    xv = x_ref[0]                                               # (C, XWp) bf16, in VMEM
    acc = jnp.zeros((OC_T, LO), jnp.float32)
    for ki in range(K):                                         # unrolled K*K tap accumulation
        for kj in range(K):
            t = ki * K + kj
            off = ki * Wp + kj
            acc = acc + jnp.dot(w_ref[t], xv[:, off:off + LO],
                                preferred_element_type=jnp.float32)
    o_ref[0] = (acc + b_ref[...]).astype(o_ref.dtype)


def run_dyn_conv(x_flat, w_taps, b_col, *, K, C, Wp, LO, OC_T, out_dtype):
    B, _, XWp = x_flat.shape
    KK, OC_pad, _ = w_taps.shape
    n_oc = OC_pad // OC_T
    kernel = functools.partial(_dyn_conv_kernel, K=K, C=C, Wp=Wp, LO=LO, OC_T=OC_T)

    # double-buffered VMEM estimate; raise the scoped limit only when needed
    est = 2 * (C * XWp * 2 + KK * OC_T * C * 2 + OC_T * 4
               + OC_T * LO * jnp.dtype(out_dtype).itemsize)
    cp_kwargs = dict(dimension_semantics=("parallel", "parallel"))
    if est > (12 << 20):
        # TODO(synk): re-derive per generation (v7x has 64 MiB physical VMEM).
        cp_kwargs["vmem_limit_bytes"] = int(min(est + (8 << 20), 64 << 20))

    return pl.pallas_call(
        kernel,
        out_shape=jax.ShapeDtypeStruct((B, OC_pad, LO), out_dtype),
        grid=(B, n_oc),
        in_specs=[
            pl.BlockSpec((1, C, XWp), lambda b, o: (b, 0, 0)),
            pl.BlockSpec((KK, OC_T, C), lambda b, o: (0, o, 0)),
            pl.BlockSpec((OC_T, 1), lambda b, o: (o, 0)),
        ],
        out_specs=pl.BlockSpec((1, OC_T, LO), lambda b, o: (b, o, 0)),
        compiler_params=pltpu.CompilerParams(**cp_kwargs),
    )(x_flat, w_taps, b_col)


# ----------------------- Module wrapper -----------------------

class DynamicConv2DPallas:
    def __init__(self, max_in_channels, out_channels, kernel_size=3, stride=1, padding=1,
                 mxu_dtype=jnp.bfloat16, conv_out_dtype=jnp.float32, oc_tile=256,
                 key=jax.random.PRNGKey(42)):
        self.max_in_channels = max_in_channels
        self.out_channels = out_channels
        self.kernel_size = kernel_size
        self.stride = stride
        self.padding = padding
        self.mxu_dtype = mxu_dtype
        self.conv_out_dtype = conv_out_dtype
        self.oc_tile = oc_tile
        k = jax.random.split(key, 8)
        mi, oc, ks = max_in_channels, out_channels, kernel_size
        # Linear weights stored as (in, out); y = x @ W + b.  f32 masters (used by reference).
        self.params = {
            "w1": jax.random.normal(k[0], (mi, 128), jnp.float32) * 0.1,
            "b1": jax.random.normal(k[1], (1, 128), jnp.float32) * 0.1,
            "w2": jax.random.normal(k[2], (128, 256), jnp.float32) * 0.05,
            "b2": jax.random.normal(k[3], (1, 256), jnp.float32) * 0.05,
            "w3": jax.random.normal(k[4], (256, oc * mi * ks * ks), jnp.float32) * 0.05,
            "b3": jax.random.normal(k[5], (1, oc * mi * ks * ks), jnp.float32) * 0.05,
            "wb": jax.random.normal(k[6], (mi, oc), jnp.float32) * 0.1,
            "bb": jax.random.normal(k[7], (1, oc), jnp.float32) * 0.1,
        }
        # bf16, lane-padded copies of the big third layer (streamed by kernel 1b).
        self.nw = oc * mi * ks * ks
        nw_pad = _round_up(self.nw, 128)
        self.w3_bf16 = jnp.pad(self.params["w3"],
                               ((0, 0), (0, nw_pad - self.nw))).astype(jnp.bfloat16)
        self.b3_bf16 = jnp.pad(self.params["b3"],
                               ((0, 0), (0, nw_pad - self.nw))).astype(jnp.bfloat16)

    def __call__(self, x):
        B, C, H, W = x.shape
        assert C <= self.max_in_channels
        K, s, p = self.kernel_size, self.stride, self.padding
        OC, MI = self.out_channels, self.max_in_channels

        # Indicator depends only on C -> identical for every sample, so the dynamic
        # weights are generated ONCE and shared across the batch (same as the reference).
        ind = jnp.zeros((1, MI), jnp.float32).at[:, :C].set(1.0)

        # --- Pallas kernels 1a/1b: weight & bias generation ---
        h2, dbias = run_mlp_head(ind, self.params)                  # (1,256) f32, (1,OC) f32
        wflat = run_w3_stream(h2, self.w3_bf16, self.b3_bf16)       # (1, NW_pad) bf16

        w_full = wflat[0, :self.nw].reshape(OC, MI, K, K)[:, :C]    # (OC, C, K, K) bf16
        w_taps = jnp.transpose(w_full, (2, 3, 0, 1)).reshape(K * K, OC, C)  # tiny
        b_col = dbias.reshape(OC, 1)                                # f32

        # --- geometry for the fused conv ---
        Hp, Wp = H + 2 * p, W + 2 * p
        OH = (Hp - K) // s + 1
        OW = (Wp - K) // s + 1
        R = (OH - 1) * s + 1                      # window-corner rows spanned by the output
        LO = _round_up(R * Wp, 128)               # lane-dense output width per image
        off_max = (K - 1) * Wp + (K - 1)
        XWp = _round_up(max(Hp * Wp, LO + off_max), 128)

        # --- x layout plumbing: bf16 FIRST, then pad/flatten (1x traffic, no replication) ---
        xb = x.astype(self.mxu_dtype)
        x_pad = jnp.pad(xb, ((0, 0), (0, 0), (p, p), (p, p)))
        x_flat = x_pad.reshape(B, C, Hp * Wp)
        if XWp > Hp * Wp:
            x_flat = jnp.pad(x_flat, ((0, 0), (0, 0), (0, XWp - Hp * Wp)))

        # --- OC tiling (parallel grid axis for large OC) ---
        OC_T = OC if OC <= self.oc_tile else self.oc_tile
        OC_pad = _round_up(OC, OC_T)
        if OC_pad != OC:
            w_taps = jnp.pad(w_taps, ((0, 0), (0, OC_pad - OC), (0, 0)))
            b_col = jnp.pad(b_col, ((0, OC_pad - OC), (0, 0)))

        # --- Pallas kernel 2: fused im2col + conv ---
        out_k = run_dyn_conv(x_flat, w_taps, b_col, K=K, C=C, Wp=Wp, LO=LO,
                             OC_T=OC_T, out_dtype=self.conv_out_dtype)  # (B, OC_pad, LO)

        # cheap extraction: already (B, OC, ...) -- reshape + (strided) slice, no transpose
        out = out_k[:, :OC, :R * Wp].reshape(B, OC, R, Wp)
        out = out[:, :, 0:(OH - 1) * s + 1:s, 0:(OW - 1) * s + 1:s]     # (B, OC, OH, OW)
        return out


# ----------------------- Reference (plain JAX, full f32, matches the PyTorch module) -----------------------

def reference_forward(mod, x):
    B, C, H, W = x.shape
    K, s, p = mod.kernel_size, mod.stride, mod.padding
    OC, MI = mod.out_channels, mod.max_in_channels
    P = mod.params
    ind = jnp.zeros((B, MI), jnp.float32).at[:, :C].set(1.0)
    h1 = jax.nn.relu(ind @ P["w1"] + P["b1"])
    h2 = jax.nn.relu(h1 @ P["w2"] + P["b2"])
    wflat = h2 @ P["w3"] + P["b3"]
    dw = wflat.reshape(B, OC, MI, K, K)[:, :, :C, :, :]
    db = ind @ P["wb"] + P["bb"]
    outs = []
    for i in range(B):
        o = jax.lax.conv_general_dilated(
            x[i:i + 1], dw[i], window_strides=(s, s),
            padding=[(p, p), (p, p)],
            dimension_numbers=("NCHW", "OIHW", "NCHW"))
        outs.append(o + db[i][None, :, None, None])
    return jnp.concatenate(outs, axis=0)


if __name__ == "__main__":
    key = jax.random.PRNGKey(0)
    B, C, H, W = 2, 4, 16, 16
    max_in_channels, out_channels = 4, 8
    x = jax.random.normal(key, (B, C, H, W), jnp.float32)

    mod = DynamicConv2DPallas(max_in_channels, out_channels,
                              kernel_size=3, stride=1, padding=1)

    out = jax.block_until_ready(mod(x))
    ref = jax.block_until_ready(reference_forward(mod, x))

    assert out.shape == (B, out_channels, H, W), out.shape
    # bf16 MXU operands / bf16 w3 stream (f32 accumulation) -> compare with matching tolerance
    err = float(jnp.max(jnp.abs(out - ref)))
    assert err < 3e-2, err
    print("KERNEL_OK")
</pallas_src>

<mosaic_0001>
module attributes {stable_mosaic.version = 11 : i64} {
  func.func @_mlp_head_kernel(%arg0: i32, %arg1: memref<1x4xf32, #tpu.memory_space<vmem>>, %arg2: memref<4x128xf32, #tpu.memory_space<vmem>>, %arg3: memref<1x128xf32, #tpu.memory_space<vmem>>, %arg4: memref<128x256xf32, #tpu.memory_space<vmem>>, %arg5: memref<1x256xf32, #tpu.memory_space<vmem>>, %arg6: memref<4x8xf32, #tpu.memory_space<vmem>>, %arg7: memref<1x8xf32, #tpu.memory_space<vmem>>, %arg8: memref<1x256xf32, #tpu.memory_space<vmem>>, %arg9: memref<1x8xf32, #tpu.memory_space<vmem>>) attributes {dimension_semantics = [#tpu.dimension_semantics<arbitrary>], iteration_bounds = array<i64: 1>, scalar_prefetch = 0 : i64, scratch_operands = 0 : i64, tpu.core_type = #tpu.core_type<tc>, window_params = [{pipeline_mode = #tpu.pipeline_mode<synchronous>, transform_indices = @transform_0, window_bounds = array<i64: 1, 4>}, {pipeline_mode = #tpu.pipeline_mode<synchronous>, transform_indices = @transform_1, window_bounds = array<i64: 4, 128>}, {pipeline_mode = #tpu.pipeline_mode<synchronous>, transform_indices = @transform_2, window_bounds = array<i64: 1, 128>}, {pipeline_mode = #tpu.pipeline_mode<synchronous>, transform_indices = @transform_3, window_bounds = array<i64: 128, 256>}, {pipeline_mode = #tpu.pipeline_mode<synchronous>, transform_indices = @transform_4, window_bounds = array<i64: 1, 256>}, {pipeline_mode = #tpu.pipeline_mode<synchronous>, transform_indices = @transform_5, window_bounds = array<i64: 4, 8>}, {pipeline_mode = #tpu.pipeline_mode<synchronous>, transform_indices = @transform_6, window_bounds = array<i64: 1, 8>}, {pipeline_mode = #tpu.pipeline_mode<synchronous>, transform_indices = @transform_7, window_bounds = array<i64: 1, 256>}, {pipeline_mode = #tpu.pipeline_mode<synchronous>, transform_indices = @transform_8, window_bounds = array<i64: 1, 8>}]} {
    %c0 = arith.constant 0 : index
    %c0_0 = arith.constant 0 : index
    %0 = vector.load %arg1[%c0, %c0_0] : memref<1x4xf32, #tpu.memory_space<vmem>>, vector<1x4xf32>
    %c0_1 = arith.constant 0 : index
    %c0_2 = arith.constant 0 : index
    %1 = vector.load %arg2[%c0_1, %c0_2] : memref<4x128xf32, #tpu.memory_space<vmem>>, vector<4x128xf32>
    %cst = arith.constant dense<0.000000e+00> : vector<1x128xf32>
    %2 = tpu.matmul %0, %1, %cst {dimension_numbers = #tpu.dot_dimension_numbers<[1], [0], [0], [1], [0, 0, 1, 1], [], []>} : vector<1x4xf32>, vector<4x128xf32>, vector<1x128xf32> -> vector<1x128xf32>
    %c0_3 = arith.constant 0 : index
    %c0_4 = arith.constant 0 : index
    %3 = vector.load %arg3[%c0_3, %c0_4] : memref<1x128xf32, #tpu.memory_space<vmem>>, vector<1x128xf32>
    %4 = arith.addf %2, %3 : vector<1x128xf32>
    %cst_5 = arith.constant 0.000000e+00 : f32
    %5 = vector.broadcast %cst_5 : f32 to vector<1x128xf32>
    %6 = arith.maximumf %4, %5 : vector<1x128xf32>
    %c0_6 = arith.constant 0 : index
    %c0_7 = arith.constant 0 : index
    %7 = vector.load %arg4[%c0_6, %c0_7] : memref<128x256xf32, #tpu.memory_space<vmem>>, vector<128x256xf32>
    %cst_8 = arith.constant dense<0.000000e+00> : vector<1x256xf32>
    %8 = tpu.matmul %6, %7, %cst_8 {dimension_numbers = #tpu.dot_dimension_numbers<[1], [0], [0], [1], [0, 0, 1, 1], [], []>} : vector<1x128xf32>, vector<128x256xf32>, vector<1x256xf32> -> vector<1x256xf32>
    %c0_9 = arith.constant 0 : index
    %c0_10 = arith.constant 0 : index
    %9 = vector.load %arg5[%c0_9, %c0_10] : memref<1x256xf32, #tpu.memory_space<vmem>>, vector<1x256xf32>
    %10 = arith.addf %8, %9 : vector<1x256xf32>
    %cst_11 = arith.constant 0.000000e+00 : f32
    %11 = vector.broadcast %cst_11 : f32 to vector<1x256xf32>
    %12 = arith.maximumf %10, %11 : vector<1x256xf32>
    %c0_12 = arith.constant 0 : index
    %c0_13 = arith.constant 0 : index
    %13 = vector.load %arg8[%c0_12, %c0_13] : memref<1x256xf32, #tpu.memory_space<vmem>>, vector<1x256xf32>
    tpu.vector_store %arg8[%c0_12, %c0_13], %12 {strides = array<i32>} : memref<1x256xf32, #tpu.memory_space<vmem>>, vector<1x256xf32>,
    %c0_14 = arith.constant 0 : index
    %c0_15 = arith.constant 0 : index
    %14 = vector.load %arg6[%c0_14, %c0_15] : memref<4x8xf32, #tpu.memory_space<vmem>>, vector<4x8xf32>
    %cst_16 = arith.constant dense<0.000000e+00> : vector<1x8xf32>
    %15 = tpu.matmul %0, %14, %cst_16 {dimension_numbers = #tpu.dot_dimension_numbers<[1], [0], [0], [1], [0, 0, 1, 1], [], []>} : vector<1x4xf32>, vector<4x8xf32>, vector<1x8xf32> -> vector<1x8xf32>
    %c0_17 = arith.constant 0 : index
    %c0_18 = arith.constant 0 : index
    %16 = vector.load %arg7[%c0_17, %c0_18] : memref<1x8xf32, #tpu.memory_space<vmem>>, vector<1x8xf32>
    %17 = arith.addf %15, %16 : vector<1x8xf32>
    %c0_19 = arith.constant 0 : index
    %c0_20 = arith.constant 0 : index
    %18 = vector.load %arg9[%c0_19, %c0_20] : memref<1x8xf32, #tpu.memory_space<vmem>>, vector<1x8xf32>
    tpu.vector_store %arg9[%c0_19, %c0_20], %17 {strides = array<i32>} : memref<1x8xf32, #tpu.memory_space<vmem>>, vector<1x8xf32>,
    return
  }
  func.func @transform_0(%arg0: i32) -> (i32, i32) {
    %c0_i32 = arith.constant 0 : i32
    %c0_i32_0 = arith.constant 0 : i32
    %c0_i32_1 = arith.constant 0 : i32
    return %c0_i32, %c0_i32_0 : i32, i32
  }
  func.func @transform_1(%arg0: i32) -> (i32, i32) {
    %c0_i32 = arith.constant 0 : i32
    %c0_i32_0 = arith.constant 0 : i32
    %c0_i32_1 = arith.constant 0 : i32
    return %c0_i32, %c0_i32_0 : i32, i32
  }
  func.func @transform_2(%arg0: i32) -> (i32, i32) {
    %c0_i32 = arith.constant 0 : i32
    %c0_i32_0 = arith.constant 0 : i32
    %c0_i32_1 = arith.constant 0 : i32
    return %c0_i32, %c0_i32_0 : i32, i32
  }
  func.func @transform_3(%arg0: i32) -> (i32, i32) {
    %c0_i32 = arith.constant 0 : i32
    %c0_i32_0 = arith.constant 0 : i32
    %c0_i32_1 = arith.constant 0 : i32
    return %c0_i32, %c0_i32_0 : i32, i32
  }
  func.func @transform_4(%arg0: i32) -> (i32, i32) {
    %c0_i32 = arith.constant 0 : i32
    %c0_i32_0 = arith.constant 0 : i32
    %c0_i32_1 = arith.constant 0 : i32
    return %c0_i32, %c0_i32_0 : i32, i32
  }
  func.func @transform_5(%arg0: i32) -> (i32, i32) {
    %c0_i32 = arith.constant 0 : i32
    %c0_i32_0 = arith.constant 0 : i32
    %c0_i32_1 = arith.constant 0 : i32
    return %c0_i32, %c0_i32_0 : i32, i32
  }
  func.func @transform_6(%arg0: i32) -> (i32, i32) {
    %c0_i32 = arith.constant 0 : i32
    %c0_i32_0 = arith.constant 0 : i32
    %c0_i32_1 = arith.constant 0 : i32
    return %c0_i32, %c0_i32_0 : i32, i32
  }
  func.func @transform_7(%arg0: i32) -> (i32, i32) {
    %c0_i32 = arith.constant 0 : i32
    %c0_i32_0 = arith.constant 0 : i32
    %c0_i32_1 = arith.constant 0 : i32
    return %c0_i32, %c0_i32_0 : i32, i32
  }
  func.func @transform_8(%arg0: i32) -> (i32, i32) {
    %c0_i32 = arith.constant 0 : i32
    %c0_i32_0 = arith.constant 0 : i32
    %c0_i32_1 = arith.constant 0 : i32
    return %c0_i32, %c0_i32_0 : i32, i32
  }
}

</mosaic_0001>

<bundles_post_ra>
// kernel: tpu_custom_call.1
= control target key start
LH: loop header
LB: loop body
LE: loop exit
PB: predicated region body
PF: predicated region fallthrough
CT: control target
= control target key end

     0   :  { %14 = vsyncpa [#allocation3], 0  ;;  %s624_s0 = inlined_call_operand.hbm [shape: f32[1,4], index: 0, kind: input, shape index: {}]   ;;  %s625_s1 = inlined_call_operand.hbm [shape: f32[4,128], index: 1, kind: input, shape index: {}]   ;;  %s626_s2 = inlined_call_operand.vmem [shape: f32[1,128], index: 2, kind: input, shape index: {}]   ;;  %s627_s3 = inlined_call_operand.hbm [shape: f32[128,256], index: 3, kind: input, shape index: {}]   ;;  %s628_s4 = inlined_call_operand.vmem [shape: f32[1,256], index: 4, kind: input, shape index: {}]   ;;  %s629_s5 = inlined_call_operand.vmem [shape: f32[4,8], index: 5, kind: input, shape index: {}]   ;;  %s630_s6 = inlined_call_operand.vmem [shape: f32[1,8], index: 6, kind: input, shape index: {}]   ;;  %s631_s7 = inlined_call_operand.hbm [shape: f32[1,256], index: 7, kind: output, shape index: {0}]   ;;  %s632_s8 = inlined_call_operand.hbm [shape: f32[1,8], index: 8, kind: output, shape index: {1}]  }
   0x1   :  { %15 = vsyncpa [#allocation6], 0 }
   0x2   :  { %16 = vsyncpa [#allocation4], 0 }
   0x3   :  { %17 = vsyncpa [#allocation10], 0  ;;  %s532_s27 = smov [#allocation5]   ;;  %s533_s29 = smov [#allocation2]  }
   0x4   :  { %s34_s28 = sshll.u32 %s532_s27, 4  ;;  %s24_s30 = sshll.u32 %s533_s29, 4  ;;  %s35_s28 = int_to_ptr.vmem [resolvable:$true] %s34_s28  ;;  %s25_s30 = int_to_ptr.vmem [resolvable:$true] %s24_s30 }
   0x5   :  { %s432_s9 = scalar_lea.vmem %s35_s28, 64  ;;  %p437_p1 = scmp.lt.s32.totalorder %s35_s28, %s35_s28 }
   0x6   :  { %p433_p0 = scmp.ne.s32.totalorder %s35_s28, %s432_s9  ;;  %p438_p2 = scmp.lt.s32.totalorder %s432_s9, %s432_s9 }
   0x8   :  { %p439_p3 = por %p438_p2, %p437_p1 }
   0xa   :  { %p440_p4 = pnand %p439_p3, %p433_p0 }
   0xc   :  { %443 = shalt.err (!%p440_p4)
}
   0xd   :  { %37 = dma.hbm_to_vmem [thread:$0]  %s625_s1, 64, %s35_s28, [#allocation6]  }
   0xe   :  { %s452_s12 = scalar_lea.vmem %s25_s30, 16  ;;  %s456_s13 = scalar_lea.vmem %s25_s30, 32 }
   0xf   :  { %p453_p5 = scmp.ne.s32.totalorder %s25_s30, %s452_s12  ;;  %p457_p6 = scmp.lt.s32.totalorder %s25_s30, %s25_s30 }
  0x10   :  { %p458_p7 = scmp.lt.s32.totalorder %s456_s13, %s452_s12 }
  0x12   :  { %p459_p8 = por %p458_p7, %p457_p6 }
  0x14   :  { %p460_p9 = pnand %p459_p8, %p453_p5 }
  0x16   :  { %463 = shalt.err (!%p460_p9)
}
  0x17   :  { %27 = dma.hbm_to_vmem [thread:$0]  %s624_s0, 16, %s25_s30, [#allocation3]  }
  0x18   :  { %s534_s16 = smov [#allocation7]  }
  0x19   :  { %s45_s17 = sshll.u32 %s534_s16, 4  ;;  %s46_s17 = int_to_ptr.vmem [resolvable:$true] %s45_s17 }
  0x1a   :  { %s472_s18 = scalar_lea.vmem %s46_s17, 4096  ;;  %p477_p11 = scmp.lt.s32.totalorder %s46_s17, %s46_s17 }
  0x1b   :  { %p473_p10 = scmp.ne.s32.totalorder %s46_s17, %s472_s18  ;;  %p478_p12 = scmp.lt.s32.totalorder %s472_s18, %s472_s18 }
  0x1d   :  { %p479_p13 = por %p478_p12, %p477_p11 }
  0x1f   :  { %p480_p0 = pnand %p479_p13, %p473_p10 }
  0x21   :  { %483 = shalt.err (!%p480_p0)
}
  0x22   :  { %s535_s1 = smov 256   ;;  %s536_s19 = smov 16  }
  0x23   :  { %51 = dma.hbm_to_vmem [thread:$0]  %s627_s3, 4096, %s46_s17, [#allocation6], %s535_s1, %s535_s1, %s536_s19  }
  0x24   :  { %524 = dma.done.wait [#allocation3], 16  }
  0x25   :  { %525 = vsyncadd [#allocation3], 4294967280 }
  0x26   :  { %526 = dma.done.wait [#allocation6], 4160  }
  0x27   :  { %527 = vsyncadd [#allocation6], 4294963136  ;;  %v537_v0 = vmov 0.0   ;;  %vm538_vm0 = vmmov 0   ;;  %vm74_vm1 = vcmask 1043456   ;;  %vm70_vm2 = vcmask 31744  }
  0x28   :  { %404 = vmatprep.subr.mxu0 %v537_v0  ;;  %406 = vmatprep.mubr.msk.f32.mxu0 %vm538_vm0, %v537_v0  ;;  %v68_v1 = vld [vmem:[#allocation5] sm:$0xf]  ;;  %v597_v2 = vld [vmem:[#allocation2] sm:$0x1]  ;;  %v179_v4 = vld [vmem:[#allocation7 + $0xf0] sm:$0xff]  ;;  %vm364_vm3 = vcmask 57344  }
  0x29   :  { %257 = vmatprep.mubr.f32.mxu1 %v537_v0  ;;  %v180_v3 = vld [vmem:[#allocation7 + $0xf8] sm:$0xff]  ;;  %405 = vmatpush3.msk.msra.mxu0 %vm74_vm1, %v68_v1  ;;  %v178_v5 = vld [vmem:[#allocation7 + $0xe8] sm:$0xff]  ;;  %v177_v6 = vld [vmem:[#allocation7 + $0xe0] sm:$0xff] }
  0x2a   :  { %193 = vmatprep.subr.mxu1 %v180_v3  ;;  %407 = vmatmul.mubr.msk.f32.vlgmr.msra.gmra.mxu0 %vm70_vm2, %v597_v2  ;;  %v176_v7 = vld [vmem:[#allocation7 + $0xd8] sm:$0xff]  ;;  %v175_v8 = vld [vmem:[#allocation7 + $0xd0] sm:$0xff]  ;;  %v174_v9 = vld [vmem:[#allocation7 + $0xc8] sm:$0xff] }
  0x2b   :  { %194 = vmatpush1.msra.mxu1 %v179_v4  ;;  %409 = vmatprep.subr.mxu0 %v537_v0  ;;  %v173_v10 = vld [vmem:[#allocation7 + $0xc0] sm:$0xff]  ;;  %v172_v11 = vld [vmem:[#allocation7 + $0xb8] sm:$0xff]  ;;  %v171_v12 = vld [vmem:[#allocation7 + $0xb0] sm:$0xff] }
  0x2c   :  { %195 = vmatprep.subr.mxu1 %v178_v5  ;;  %411 = vmatprep.mubr.msk.f32.mxu0 %vm538_vm0, %v537_v0  ;;  %v170_v13 = vld [vmem:[#allocation7 + $0xa8] sm:$0xff]  ;;  %v169_v14 = vld [vmem:[#allocation7 + $0xa0] sm:$0xff]  ;;  %v168_v15 = vld [vmem:[#allocation7 + $0x98] sm:$0xff] }
  0x2d   :  { %196 = vmatpush1.msra.mxu1 %v177_v6  ;;  %v167_v16 = vld [vmem:[#allocation7 + $0x90] sm:$0xff]  ;;  %v166_v17 = vld [vmem:[#allocation7 + $0x88] sm:$0xff]  ;;  %v165_v18 = vld [vmem:[#allocation7 + $0x80] sm:$0xff] }
  0x2e   :  { %197 = vmatprep.subr.mxu1 %v176_v7  ;;  %v164_v19 = vld [vmem:[#allocation7 + $0x78] sm:$0xff]  ;;  %v163_v20 = vld [vmem:[#allocation7 + $0x70] sm:$0xff]  ;;  %v162_v21 = vld [vmem:[#allocation7 + $0x68] sm:$0xff] }
  0x2f   :  { %198 = vmatpush1.msra.mxu1 %v175_v8  ;;  %v161_v22 = vld [vmem:[#allocation7 + $0x60] sm:$0xff]  ;;  %v160_v23 = vld [vmem:[#allocation7 + $0x58] sm:$0xff]  ;;  %v159_v24 = vld [vmem:[#allocation7 + $0x50] sm:$0xff] }
  0x30   :  { %199 = vmatprep.subr.mxu1 %v174_v9  ;;  %v158_v25 = vld [vmem:[#allocation7 + $0x48] sm:$0xff]  ;;  %v157_v26 = vld [vmem:[#allocation7 + $0x40] sm:$0xff]  ;;  %v156_v27 = vld [vmem:[#allocation7 + $0x38] sm:$0xff] }
  0x31   :  { %200 = vmatpush1.msra.mxu1 %v173_v10  ;;  %v155_v28 = vld [vmem:[#allocation7 + $0x30] sm:$0xff]  ;;  %v154_v29 = vld [vmem:[#allocation7 + $0x28] sm:$0xff]  ;;  %v153_v30 = vld [vmem:[#allocation7 + $0x20] sm:$0xff] }
  0x32   :  { %201 = vmatprep.subr.mxu1 %v172_v11  ;;  %v152_v31 = vld [vmem:[#allocation7 + $0x18] sm:$0xff]  ;;  %v151_v32 = vld [vmem:[#allocation7 + $0x10] sm:$0xff]  ;;  %v150_v33 = vld [vmem:[#allocation7 + $0x8] sm:$0xff] }
  0x33   :  { %202 = vmatpush1.msra.mxu1 %v171_v12  ;;  %v149_v34 = vld [vmem:[#allocation7] sm:$0xff]  ;;  %v289_v35 = vld [vmem:[%s629_s5] sm:$0xf]  ;;  %s539_s5 = smov [#allocation9]  }
  0x34   :  { %203 = vmatprep.subr.mxu1 %v170_v13  ;;  %410 = vmatpush3.msk.msra.mxu0 %vm74_vm1, %v289_v35  ;;  %v69_v36 = vld [vmem:[%s626_s2] sm:$0x1]  ;;  %s382_s26 = sshll.u32 %s539_s5, 4  ;;  %s383_s26 = int_to_ptr.vmem [resolvable:$true] %s382_s26 }
  0x35   :  { %204 = vmatpush1.msra.mxu1 %v169_v14  ;;  %412 = vmatmul.mubr.msk.f32.vlgmr.msra.gmra.mxu0 %vm70_vm2, %v597_v2  ;;  %v290_v42 = vld [vmem:[%s630_s6] sm:$0x1]  ;;  %s484_s27 = scalar_lea.vmem %s383_s26, 16  ;;  %s488_s2 = scalar_lea.vmem %s383_s26, 32 }
  0x36   :  { %205 = vmatprep.subr.mxu1 %v168_v15  ;;  %p485_p1 = scmp.ne.s32.totalorder %s383_s26, %s484_s27  ;;  %p489_p2 = scmp.lt.s32.totalorder %s383_s26, %s383_s26 }
  0x37   :  { %206 = vmatpush1.msra.mxu1 %v167_v16  ;;  %p490_p3 = scmp.lt.s32.totalorder %s488_s2, %s484_s27 }
  0x38   :  { %207 = vmatprep.subr.mxu1 %v166_v17 }
  0x39   :  { %208 = vmatpush1.msra.mxu1 %v165_v18  ;;  %p491_p4 = por %p490_p3, %p489_p2 }
  0x3a   :  { %209 = vmatprep.subr.mxu1 %v164_v19 }
  0x3b   :  { %210 = vmatpush1.msra.mxu1 %v163_v20  ;;  %p492_p5 = pnand %p491_p4, %p485_p1 }
  0x3c   :  { %211 = vmatprep.subr.mxu1 %v162_v21 }
  0x3d   :  { %212 = vmatpush1.msra.mxu1 %v161_v22 }
  0x3e   :  { %213 = vmatprep.subr.mxu1 %v160_v23 }
  0x3f   :  { %214 = vmatpush1.msra.mxu1 %v159_v24 }
  0x40   :  { %215 = vmatprep.subr.mxu1 %v158_v25 }
  0x41   :  { %216 = vmatpush1.msra.mxu1 %v157_v26 }
  0x42   :  { %217 = vmatprep.subr.mxu1 %v156_v27 }
  0x43   :  { %218 = vmatpush1.msra.mxu1 %v155_v28 }
  0x44   :  { %219 = vmatprep.subr.mxu1 %v154_v29 }
  0x45   :  { %220 = vmatpush1.msra.mxu1 %v153_v30 }
  0x46   :  { %221 = vmatprep.subr.mxu1 %v152_v31 }
  0x47   :  { %222 = vmatpush1.msra.mxu1 %v151_v32 }
  0x48   :  { %223 = vmatprep.subr.mxu1 %v150_v33 }
  0x49   :  { %224 = vmatpush1.msra.mxu1 %v149_v34 }
  0xea   :  { %v144_v37 = vpop.f32.mrf.mxu0 }
  0xeb   :  { %v145_v38 = vadd.f32 %v144_v37, %v69_v36 }
  0xec   :  { %v408_v39 = vpop.f32.mrf.mxu0 }
  0xed   :  { %v148_v40 = vmax.f32 %v145_v38, 0.0 }
  0xef   :  { %258 = vmatmul.mubr.f32.vlgmr.msra.gmra.mxu1 %v148_v40 }
  0xf5   :  { %v360_v41 = vpop.f32.mrf.mxu0 }
  0xf6   :  { %v361_v43 = vadd.f32 %v360_v41, %v290_v42 }
  0xf7   :  { %v413_v44 = vpop.f32.mrf.mxu0 }
  0xf8   :  { %365 = vst.msk [vmem:[#allocation9] sm:$0x1] %vm364_vm3, %v361_v43 }
  0xf9   :  { %495 = shalt.err (!%p492_p5)
}
  0xfa   :  { %385 = dma.vmem_to_hbm [thread:$0]  %s383_s26, 16, %s632_s8, [#allocation10]   ;;  %v183_v45 = vlaneseq  ;;  %v181_v48 = vld [vmem:[%s628_s4] sm:$0x3]  ;;  %v540_v51 = vmov 1966171168  }
  0xfb   :  { %v270_v52 = vunpack.c.l.s4 %v540_v51  ;;  %s541_s8 = smov [#allocation8]  }
  0xfc   :  { %v184_v46 = vshrl.u32 %v183_v45, 7  ;;  %s372_s9 = sshll.u32 %s541_s8, 4  ;;  %vm286_vm4 = vcmp.lt.s32.totalorder %v183_v45, 256  ;;  %s373_s9 = int_to_ptr.vmem [resolvable:$true] %s372_s9 }
  0xfd   :  { %v271_v56 = vunpack.c.0.s8 %v270_v52  ;;  %s504_s4 = scalar_lea.vmem %s373_s9, 32  ;;  %p509_p7 = scmp.lt.s32.totalorder %s373_s9, %s373_s9 }
  0xfe   :  { %v185_v47 = vsub.s32 0, %v184_v46  ;;  %v189_v49 = vsub.s32 1, %v184_v46  ;;  %p505_p6 = scmp.ne.s32.totalorder %s373_s9, %s504_s4  ;;  %p510_p8 = scmp.lt.s32.totalorder %s504_s4, %s504_s4 }
  0xff   :  { %v274_v61 = vsub.s32 %v271_v56, %v184_v46 }
 0x100   :  { %v186_v50 = vrot.slane %v181_v48, %v185_v47  ;;  %v190_v53 = vrot.slane %v181_v48, %v189_v49  ;;  %p511_p9 = por %p510_p8, %p509_p7 }
 0x102   :  { %p512_p10 = pnand %p511_p9, %p505_p6 }
 0x1af   :  { %v259_v54 = vpop.f32.mrf.mxu1 }
 0x1b0   :  { %v260_v55 = vadd.f32 %v259_v54, %v186_v50 }
 0x1b1   :  { %v261_v57 = vpop.f32.mrf.mxu1 }
 0x1b2   :  { %v262_v58 = vadd.f32 %v261_v57, %v190_v53  ;;  %v264_v59 = vmax.f32 %v260_v55, 0.0 }
 0x1b4   :  { %v265_v60 = vmax.f32 %v262_v58, 0.0 }
 0x1b6   :  { %v268_v62 = vcombine.low %v264_v59, %v265_v60 }
 0x1b8   :  { %v275_v63 = vrot.slane %v268_v62, %v274_v61 }
 0x1ba   :  { %v282_v0 = vrot.slane %v275_v63, %v274_v61 }
 0x1bc   :  { %288 = vst.msk [vmem:[#allocation8] sm:$0x3] %vm286_vm4, %v282_v0 }
 0x1bd   :  { %515 = shalt.err (!%p512_p10)
}
 0x1be   :  { %375 = dma.vmem_to_hbm [thread:$0]  %s373_s9, 32, %s631_s7, [#allocation4]  }
 0x1bf   :  { %528 = dma.done.wait [#allocation4], 32  }
 0x1c0   :  { %529 = vsyncadd [#allocation4], 4294967264 }
 0x1c1   :  { %530 = dma.done.wait [#allocation10], 16  }
 0x1c2   :  { %531 = vsyncadd [#allocation10], 4294967280 }
 0x1c3   :  { %392 = vsyncpa [#allocation3], 1 }
 0x1c4   :  { %393 = vsyncpa [#allocation6], 1 }
 0x1c5   :  { %394 = vsyncpa [#allocation4], 1 }
 0x1c6   :  { %395 = vsyncpa [#allocation10], 1 }

</bundles_post_ra>
